<compile_context>
chip_gen: v5e
topology: v5e:2x2
jax: 0.10.0
libtpu: 0.0.40
codegen_flags: <defaults>
</compile_context>

<pallas_src>
import numpy as np
import jax
import jax.numpy as jnp
from jax.experimental import pallas as pl
from jax.experimental.pallas import tpu as pltpu


# ----------------------------- Pallas kernel ------------------------------- #

def _make_branch_kernel(C, Wp, Lq):
    """Fused BasicBlock branch for static channel count C, padded width Wp, Lq=H*Wp."""
    taps = [kh * Wp + kw for kh in range(3) for kw in range(3)]   # flat tap offsets

    def kernel(x_ref, w_ref, sb_ref, mask_ref, out_ref, cols_ref, o1p_ref):
        # x_ref   : (1,1,C,Lpad) bf16  zero-padded, channel-major, row-flattened input
        # w_ref   : (1,2,C,9C)   bf16  [conv1, conv2] weights as (Cout, tap*Cin)
        # sb_ref  : (1,4,C,1)    f32   [scale1, shift1, scale2, shift2] (folded BN)
        # mask_ref: (1,Lq)       f32   1.0 on valid image columns, 0.0 on row-wrap cols
        # out_ref : (1,1,C,Lq)   f32
        # cols_ref: (9C,Lq)      bf16  scratch: stacked shifted views (im2col, VMEM only)
        # o1p_ref : (C,Lpad)     bf16  scratch: re-padded conv1 activation
        x2d = x_ref[0, 0]                                       # (C, Lpad) bf16

        # ---- conv1 + bn1 + relu : one K = 9*C MXU contraction ----
        for k, off in enumerate(taps):
            cols_ref[k * C:(k + 1) * C, :] = x2d[:, off:off + Lq]
        acc = jnp.dot(w_ref[0, 0], cols_ref[...],
                      preferred_element_type=jnp.float32)       # (C, Lq) f32
        o1 = jnp.maximum(acc * sb_ref[0, 0] + sb_ref[0, 1], 0.0)

        # zero row-wrap garbage columns, re-pad into VMEM scratch for conv2
        o1 = o1 * mask_ref[...]
        o1p_ref[...] = jnp.zeros_like(o1p_ref)
        o1p_ref[:, Wp + 1:Wp + 1 + Lq] = o1.astype(jnp.bfloat16)

        # ---- conv2 + bn2 + residual + relu ----
        for k, off in enumerate(taps):
            cols_ref[k * C:(k + 1) * C, :] = o1p_ref[:, off:off + Lq]
        acc = jnp.dot(w_ref[0, 1], cols_ref[...],
                      preferred_element_type=jnp.float32)       # (C, Lq) f32
        res = x2d[:, Wp + 1:Wp + 1 + Lq].astype(jnp.float32)    # original x (identity)
        out = jnp.maximum(acc * sb_ref[0, 2] + sb_ref[0, 3] + res, 0.0)
        out_ref[0, 0] = out.astype(out_ref.dtype)

    return kernel


# ------------------------------ JAX wrapper -------------------------------- #

def basic_block_forward(x_nchw, params):
    """Pallas implementation of BasicBlock.forward (NCHW in, NCHW out, channels 2*C)."""
    c = params["in_channel"]
    n, c2, h, w = x_nchw.shape
    assert c2 == 2 * c, (c2, c)
    wp = w + 2                       # padded width
    lq = h * wp                      # conv output length in padded-row coordinates
    lpad = (h + 3) * wp              # padded flattened input (1 top + 2 bottom pad rows)

    # channel-major, zero-padded, row-flattened input; x and g branches stacked.
    xg = jnp.stack([x_nchw[:, :c], x_nchw[:, c:]], axis=0)          # (2, N, C, H, W)
    xg = jnp.pad(xg, ((0, 0), (0, 0), (0, 0), (1, 2), (1, 1)))      # (2, N, C, H+3, W+2)
    xg = xg.reshape(2, n, c, lpad).astype(jnp.bfloat16)

    # 1.0 on valid image columns, 0.0 on the two row-wrap columns of each padded row.
    colmask = (jnp.arange(lq, dtype=jnp.int32) % wp < w)
    colmask = colmask.astype(jnp.float32).reshape(1, lq)

    kernel = _make_branch_kernel(c, wp, lq)
    out = pl.pallas_call(
        kernel,
        out_shape=jax.ShapeDtypeStruct((2, n, c, lq), jnp.float32),
        grid_spec=pltpu.PrefetchScalarGridSpec(
            num_scalar_prefetch=0,
            grid=(2, n),                                    # (branch, batch)
            in_specs=[
                pl.BlockSpec((1, 1, c, lpad), lambda b, i: (b, i, 0, 0)),
                pl.BlockSpec((1, 2, c, 9 * c), lambda b, i: (b, 0, 0, 0)),
                pl.BlockSpec((1, 4, c, 1), lambda b, i: (b, 0, 0, 0)),
                pl.BlockSpec((1, lq), lambda b, i: (0, 0)),
            ],
            out_specs=pl.BlockSpec((1, 1, c, lq), lambda b, i: (b, i, 0, 0)),
            scratch_shapes=[
                pltpu.VMEM((9 * c, lq), jnp.bfloat16),      # im2col columns (VMEM only)
                pltpu.VMEM((c, lpad), jnp.bfloat16),        # re-padded conv1 activation
            ],
        ),
        compiler_params=pltpu.CompilerParams(
            dimension_semantics=("parallel", "parallel"),   # megacore-shardable grid
            vmem_limit_bytes=32 * 1024 * 1024,
        ),
    )(xg, params["wstack"], params["sbstack"], colmask)

    out = out.reshape(2, n, c, h, wp)[..., :w]              # strip row-wrap columns
    return jnp.concatenate([out[0], out[1]], axis=1)        # (N, 2C, H, W), NCHW


# ------------------------- deterministic parameters ------------------------ #

def init_params(key, c):
    ks = jax.random.split(key, 8)

    def convw(k):
        wgt = jax.random.normal(k, (3, 3, c, c), jnp.float32) * 0.2     # HWIO
        return wgt.astype(jnp.bfloat16).astype(jnp.float32)             # bf16-exact

    def bn(k):
        k1, k2, k3, k4 = jax.random.split(k, 4)
        gamma = 1.0 + 0.1 * jax.random.normal(k1, (c,), jnp.float32)
        beta = 0.1 * jax.random.normal(k2, (c,), jnp.float32)
        mean = 0.1 * jax.random.normal(k3, (c,), jnp.float32)
        var = 0.5 + 0.5 * jnp.abs(jax.random.normal(k4, (c,), jnp.float32))
        scale = gamma / jnp.sqrt(var + 1e-5)
        shift = beta - mean * scale
        return scale, shift

    w1, w1g, w2, w2g = convw(ks[0]), convw(ks[1]), convw(ks[2]), convw(ks[3])
    s1, b1 = bn(ks[4]); s1g, b1g = bn(ks[5]); s2, b2 = bn(ks[6]); s2g, b2g = bn(ks[7])

    def pack(w_hwio):                      # HWIO -> (Cout, 9*Cin), tap-major rows
        return jnp.transpose(w_hwio, (3, 0, 1, 2)).reshape(c, 9 * c)

    wstack = jnp.stack([jnp.stack([pack(w1), pack(w2)]),
                        jnp.stack([pack(w1g), pack(w2g)])]).astype(jnp.bfloat16)
    sbstack = jnp.stack([jnp.stack([s1, b1, s2, b2]),
                         jnp.stack([s1g, b1g, s2g, b2g])])[..., None].astype(jnp.float32)

    return dict(
        in_channel=c, wstack=wstack, sbstack=sbstack,
        w1_hwio=w1, w1g_hwio=w1g, w2_hwio=w2, w2g_hwio=w2g,
        s1=s1, b1=b1, s1g=s1g, b1g=b1g, s2=s2, b2=b2, s2g=s2g, b2g=b2g,
    )


# ------------------------------ reference ---------------------------------- #

def reference_forward(x_nchw, params):
    c = params["in_channel"]
    x = jnp.transpose(x_nchw[:, :c], (0, 2, 3, 1)).astype(jnp.float32)
    g = jnp.transpose(x_nchw[:, c:], (0, 2, 3, 1)).astype(jnp.float32)

    def conv(inp, wgt):
        return jax.lax.conv_general_dilated(
            inp, wgt, (1, 1), "SAME",
            dimension_numbers=("NHWC", "HWIO", "NHWC"),
            precision=jax.lax.Precision.HIGHEST)

    def q(v):   # mirror the kernel's bf16 storage of the intermediate activation
        return v.astype(jnp.bfloat16).astype(jnp.float32)

    o = q(jnp.maximum(conv(x, params["w1_hwio"]) * params["s1"] + params["b1"], 0.0))
    gg = q(jnp.maximum(conv(g, params["w1g_hwio"]) * params["s1g"] + params["b1g"], 0.0))
    o = jnp.maximum(conv(o, params["w2_hwio"]) * params["s2"] + params["b2"] + x, 0.0)
    gg = jnp.maximum(conv(gg, params["w2g_hwio"]) * params["s2g"] + params["b2g"] + g, 0.0)
    out = jnp.concatenate([o, gg], axis=-1)
    return jnp.transpose(out, (0, 3, 1, 2))


# --------------------------------- main ------------------------------------ #

if __name__ == "__main__":
    key = jax.random.PRNGKey(0)
    kp, kx = jax.random.split(key)
    C, N, H, W = 4, 2, 16, 16
    params = init_params(kp, C)
    x = jax.random.normal(kx, (N, 2 * C, H, W), jnp.float32)   # x|g stacked on channels
    x = x.astype(jnp.bfloat16).astype(jnp.float32)             # kernel runs bf16 inputs

    out = jax.block_until_ready(basic_block_forward(x, params))
    ref = jax.block_until_ready(reference_forward(x, params))

    assert out.shape == (N, 2 * C, H, W), out.shape
    np.testing.assert_allclose(np.asarray(out), np.asarray(ref), rtol=1e-2, atol=1e-2)
    print("KERNEL_OK")
</pallas_src>

<mosaic_0001>
module attributes {stable_mosaic.version = 11 : i64} {
  func.func @kernel(%arg0: i32, %arg1: i32, %arg2: memref<1x1x4x342xbf16, #tpu.memory_space<vmem>>, %arg3: memref<1x2x4x36xbf16, #tpu.memory_space<vmem>>, %arg4: memref<1x4x4x1xf32, #tpu.memory_space<vmem>>, %arg5: memref<1x288xf32, #tpu.memory_space<vmem>>, %arg6: memref<1x1x4x288xf32, #tpu.memory_space<vmem>>, %arg7: memref<36x288xbf16, #tpu.memory_space<vmem>>, %arg8: memref<4x342xbf16, #tpu.memory_space<vmem>>) attributes {dimension_semantics = [#tpu.dimension_semantics<parallel>, #tpu.dimension_semantics<parallel>], iteration_bounds = array<i64: 2, 2>, scalar_prefetch = 0 : i64, scratch_operands = 2 : i64, tpu.core_type = #tpu.core_type<tc>, window_params = [{transform_indices = @transform_0, window_bounds = array<i64: 1, 1, 4, 342>}, {transform_indices = @transform_1, window_bounds = array<i64: 1, 2, 4, 36>}, {transform_indices = @transform_2, window_bounds = array<i64: 1, 4, 4, 1>}, {pipeline_mode = #tpu.pipeline_mode<synchronous>, transform_indices = @transform_3, window_bounds = array<i64: 1, 288>}, {transform_indices = @transform_4, window_bounds = array<i64: 1, 1, 4, 288>}]} {
    %c0 = arith.constant 0 : index
    %c0_0 = arith.constant 0 : index
    %c0_1 = arith.constant 0 : index
    %c0_2 = arith.constant 0 : index
    %0 = vector.load %arg2[%c0, %c0_0, %c0_1, %c0_2] : memref<1x1x4x342xbf16, #tpu.memory_space<vmem>>, vector<1x1x4x342xbf16>
    %1 = vector.shape_cast %0 : vector<1x1x4x342xbf16> to vector<4x342xbf16>
    %2 = vector.extract_strided_slice %1 {offsets = [0, 0], sizes = [4, 288], strides = [1, 1]} : vector<4x342xbf16> to vector<4x288xbf16>
    %c0_3 = arith.constant 0 : index
    %c0_4 = arith.constant 0 : index
    %3 = vector.load %arg7[%c0_3, %c0_4] : memref<36x288xbf16, #tpu.memory_space<vmem>>, vector<4x288xbf16>
    tpu.vector_store %arg7[%c0_3, %c0_4], %2 {strides = array<i32>} : memref<36x288xbf16, #tpu.memory_space<vmem>>, vector<4x288xbf16>,
    %4 = vector.extract_strided_slice %1 {offsets = [0, 1], sizes = [4, 288], strides = [1, 1]} : vector<4x342xbf16> to vector<4x288xbf16>
    %c4 = arith.constant 4 : index
    %c0_5 = arith.constant 0 : index
    %5 = vector.load %arg7[%c4, %c0_5] : memref<36x288xbf16, #tpu.memory_space<vmem>>, vector<4x288xbf16>
    tpu.vector_store %arg7[%c4, %c0_5], %4 {strides = array<i32>} : memref<36x288xbf16, #tpu.memory_space<vmem>>, vector<4x288xbf16>,
    %6 = vector.extract_strided_slice %1 {offsets = [0, 2], sizes = [4, 288], strides = [1, 1]} : vector<4x342xbf16> to vector<4x288xbf16>
    %c8 = arith.constant 8 : index
    %c0_6 = arith.constant 0 : index
    %7 = vector.load %arg7[%c8, %c0_6] : memref<36x288xbf16, #tpu.memory_space<vmem>>, vector<4x288xbf16>
    tpu.vector_store %arg7[%c8, %c0_6], %6 {strides = array<i32>} : memref<36x288xbf16, #tpu.memory_space<vmem>>, vector<4x288xbf16>,
    %8 = vector.extract_strided_slice %1 {offsets = [0, 18], sizes = [4, 288], strides = [1, 1]} : vector<4x342xbf16> to vector<4x288xbf16>
    %c12 = arith.constant 12 : index
    %c0_7 = arith.constant 0 : index
    %9 = vector.load %arg7[%c12, %c0_7] : memref<36x288xbf16, #tpu.memory_space<vmem>>, vector<4x288xbf16>
    tpu.vector_store %arg7[%c12, %c0_7], %8 {strides = array<i32>} : memref<36x288xbf16, #tpu.memory_space<vmem>>, vector<4x288xbf16>,
    %10 = vector.extract_strided_slice %1 {offsets = [0, 19], sizes = [4, 288], strides = [1, 1]} : vector<4x342xbf16> to vector<4x288xbf16>
    %c16 = arith.constant 16 : index
    %c0_8 = arith.constant 0 : index
    %11 = vector.load %arg7[%c16, %c0_8] : memref<36x288xbf16, #tpu.memory_space<vmem>>, vector<4x288xbf16>
    tpu.vector_store %arg7[%c16, %c0_8], %10 {strides = array<i32>} : memref<36x288xbf16, #tpu.memory_space<vmem>>, vector<4x288xbf16>,
    %12 = vector.extract_strided_slice %1 {offsets = [0, 20], sizes = [4, 288], strides = [1, 1]} : vector<4x342xbf16> to vector<4x288xbf16>
    %c20 = arith.constant 20 : index
    %c0_9 = arith.constant 0 : index
    %13 = vector.load %arg7[%c20, %c0_9] : memref<36x288xbf16, #tpu.memory_space<vmem>>, vector<4x288xbf16>
    tpu.vector_store %arg7[%c20, %c0_9], %12 {strides = array<i32>} : memref<36x288xbf16, #tpu.memory_space<vmem>>, vector<4x288xbf16>,
    %14 = vector.extract_strided_slice %1 {offsets = [0, 36], sizes = [4, 288], strides = [1, 1]} : vector<4x342xbf16> to vector<4x288xbf16>
    %c24 = arith.constant 24 : index
    %c0_10 = arith.constant 0 : index
    %15 = vector.load %arg7[%c24, %c0_10] : memref<36x288xbf16, #tpu.memory_space<vmem>>, vector<4x288xbf16>
    tpu.vector_store %arg7[%c24, %c0_10], %14 {strides = array<i32>} : memref<36x288xbf16, #tpu.memory_space<vmem>>, vector<4x288xbf16>,
    %16 = vector.extract_strided_slice %1 {offsets = [0, 37], sizes = [4, 288], strides = [1, 1]} : vector<4x342xbf16> to vector<4x288xbf16>
    %c28 = arith.constant 28 : index
    %c0_11 = arith.constant 0 : index
    %17 = vector.load %arg7[%c28, %c0_11] : memref<36x288xbf16, #tpu.memory_space<vmem>>, vector<4x288xbf16>
    tpu.vector_store %arg7[%c28, %c0_11], %16 {strides = array<i32>} : memref<36x288xbf16, #tpu.memory_space<vmem>>, vector<4x288xbf16>,
    %18 = vector.extract_strided_slice %1 {offsets = [0, 38], sizes = [4, 288], strides = [1, 1]} : vector<4x342xbf16> to vector<4x288xbf16>
    %c32 = arith.constant 32 : index
    %c0_12 = arith.constant 0 : index
    %19 = vector.load %arg7[%c32, %c0_12] : memref<36x288xbf16, #tpu.memory_space<vmem>>, vector<4x288xbf16>
    tpu.vector_store %arg7[%c32, %c0_12], %18 {strides = array<i32>} : memref<36x288xbf16, #tpu.memory_space<vmem>>, vector<4x288xbf16>,
    %c0_13 = arith.constant 0 : index
    %c0_14 = arith.constant 0 : index
    %c0_15 = arith.constant 0 : index
    %c0_16 = arith.constant 0 : index
    %20 = vector.load %arg3[%c0_13, %c0_14, %c0_15, %c0_16] : memref<1x2x4x36xbf16, #tpu.memory_space<vmem>>, vector<1x1x4x36xbf16>
    %21 = vector.shape_cast %20 : vector<1x1x4x36xbf16> to vector<4x36xbf16>
    %c0_17 = arith.constant 0 : index
    %c0_18 = arith.constant 0 : index
    %22 = vector.load %arg7[%c0_17, %c0_18] : memref<36x288xbf16, #tpu.memory_space<vmem>>, vector<36x288xbf16>
    %cst = arith.constant dense<0.000000e+00> : vector<4x288xf32>
    %23 = tpu.matmul %21, %22, %cst {dimension_numbers = #tpu.dot_dimension_numbers<[1], [0], [0], [1], [0, 0, 1, 1], [], []>} : vector<4x36xbf16>, vector<36x288xbf16>, vector<4x288xf32> -> vector<4x288xf32>
    %c0_19 = arith.constant 0 : index
    %c0_20 = arith.constant 0 : index
    %c0_21 = arith.constant 0 : index
    %c0_22 = arith.constant 0 : index
    %24 = vector.load %arg4[%c0_19, %c0_20, %c0_21, %c0_22] : memref<1x4x4x1xf32, #tpu.memory_space<vmem>>, vector<1x1x4x1xf32>
    %25 = vector.shape_cast %24 : vector<1x1x4x1xf32> to vector<4x1xf32>
    %26 = vector.broadcast %25 : vector<4x1xf32> to vector<4x288xf32>
    %27 = arith.mulf %23, %26 : vector<4x288xf32>
    %c0_23 = arith.constant 0 : index
    %c1 = arith.constant 1 : index
    %c0_24 = arith.constant 0 : index
    %c0_25 = arith.constant 0 : index
    %28 = vector.load %arg4[%c0_23, %c1, %c0_24, %c0_25] : memref<1x4x4x1xf32, #tpu.memory_space<vmem>>, vector<1x1x4x1xf32>
    %29 = vector.shape_cast %28 : vector<1x1x4x1xf32> to vector<4x1xf32>
    %30 = vector.broadcast %29 : vector<4x1xf32> to vector<4x288xf32>
    %31 = arith.addf %27, %30 : vector<4x288xf32>
    %cst_26 = arith.constant 0.000000e+00 : f32
    %32 = vector.broadcast %cst_26 : f32 to vector<4x288xf32>
    %33 = arith.maximumf %31, %32 : vector<4x288xf32>
    %c0_27 = arith.constant 0 : index
    %c0_28 = arith.constant 0 : index
    %34 = vector.load %arg5[%c0_27, %c0_28] : memref<1x288xf32, #tpu.memory_space<vmem>>, vector<1x288xf32>
    %35 = vector.broadcast %34 : vector<1x288xf32> to vector<4x288xf32>
    %36 = arith.mulf %33, %35 : vector<4x288xf32>
    %cst_29 = arith.constant 0.000000e+00 : bf16
    %37 = vector.broadcast %cst_29 : bf16 to vector<4x342xbf16>
    %c0_30 = arith.constant 0 : index
    %c0_31 = arith.constant 0 : index
    %38 = vector.load %arg8[%c0_30, %c0_31] : memref<4x342xbf16, #tpu.memory_space<vmem>>, vector<4x342xbf16>
    tpu.vector_store %arg8[%c0_30, %c0_31], %37 {strides = array<i32>} : memref<4x342xbf16, #tpu.memory_space<vmem>>, vector<4x342xbf16>,
    %39 = arith.truncf %36 : vector<4x288xf32> to vector<4x288xbf16>
    %c0_32 = arith.constant 0 : index
    %c19 = arith.constant 19 : index
    %40 = vector.load %arg8[%c0_32, %c19] : memref<4x342xbf16, #tpu.memory_space<vmem>>, vector<4x288xbf16>
    tpu.vector_store %arg8[%c0_32, %c19], %39 {strides = array<i32>} : memref<4x342xbf16, #tpu.memory_space<vmem>>, vector<4x288xbf16>,
    %c0_33 = arith.constant 0 : index
    %c0_34 = arith.constant 0 : index
    %41 = vector.load %arg8[%c0_33, %c0_34] : memref<4x342xbf16, #tpu.memory_space<vmem>>, vector<4x288xbf16>
    %c0_35 = arith.constant 0 : index
    %c0_36 = arith.constant 0 : index
    %42 = vector.load %arg7[%c0_35, %c0_36] : memref<36x288xbf16, #tpu.memory_space<vmem>>, vector<4x288xbf16>
    tpu.vector_store %arg7[%c0_35, %c0_36], %41 {strides = array<i32>} : memref<36x288xbf16, #tpu.memory_space<vmem>>, vector<4x288xbf16>,
    %c0_37 = arith.constant 0 : index
    %c1_38 = arith.constant 1 : index
    %43 = vector.load %arg8[%c0_37, %c1_38] : memref<4x342xbf16, #tpu.memory_space<vmem>>, vector<4x288xbf16>
    %c4_39 = arith.constant 4 : index
    %c0_40 = arith.constant 0 : index
    %44 = vector.load %arg7[%c4_39, %c0_40] : memref<36x288xbf16, #tpu.memory_space<vmem>>, vector<4x288xbf16>
    tpu.vector_store %arg7[%c4_39, %c0_40], %43 {strides = array<i32>} : memref<36x288xbf16, #tpu.memory_space<vmem>>, vector<4x288xbf16>,
    %c0_41 = arith.constant 0 : index
    %c2 = arith.constant 2 : index
    %45 = vector.load %arg8[%c0_41, %c2] : memref<4x342xbf16, #tpu.memory_space<vmem>>, vector<4x288xbf16>
    %c8_42 = arith.constant 8 : index
    %c0_43 = arith.constant 0 : index
    %46 = vector.load %arg7[%c8_42, %c0_43] : memref<36x288xbf16, #tpu.memory_space<vmem>>, vector<4x288xbf16>
    tpu.vector_store %arg7[%c8_42, %c0_43], %45 {strides = array<i32>} : memref<36x288xbf16, #tpu.memory_space<vmem>>, vector<4x288xbf16>,
    %c0_44 = arith.constant 0 : index
    %c18 = arith.constant 18 : index
    %47 = vector.load %arg8[%c0_44, %c18] : memref<4x342xbf16, #tpu.memory_space<vmem>>, vector<4x288xbf16>
    %c12_45 = arith.constant 12 : index
    %c0_46 = arith.constant 0 : index
    %48 = vector.load %arg7[%c12_45, %c0_46] : memref<36x288xbf16, #tpu.memory_space<vmem>>, vector<4x288xbf16>
    tpu.vector_store %arg7[%c12_45, %c0_46], %47 {strides = array<i32>} : memref<36x288xbf16, #tpu.memory_space<vmem>>, vector<4x288xbf16>,
    %c0_47 = arith.constant 0 : index
    %c19_48 = arith.constant 19 : index
    %49 = vector.load %arg8[%c0_47, %c19_48] : memref<4x342xbf16, #tpu.memory_space<vmem>>, vector<4x288xbf16>
    %c16_49 = arith.constant 16 : index
    %c0_50 = arith.constant 0 : index
    %50 = vector.load %arg7[%c16_49, %c0_50] : memref<36x288xbf16, #tpu.memory_space<vmem>>, vector<4x288xbf16>
    tpu.vector_store %arg7[%c16_49, %c0_50], %49 {strides = array<i32>} : memref<36x288xbf16, #tpu.memory_space<vmem>>, vector<4x288xbf16>,
    %c0_51 = arith.constant 0 : index
    %c20_52 = arith.constant 20 : index
    %51 = vector.load %arg8[%c0_51, %c20_52] : memref<4x342xbf16, #tpu.memory_space<vmem>>, vector<4x288xbf16>
    %c20_53 = arith.constant 20 : index
    %c0_54 = arith.constant 0 : index
    %52 = vector.load %arg7[%c20_53, %c0_54] : memref<36x288xbf16, #tpu.memory_space<vmem>>, vector<4x288xbf16>
    tpu.vector_store %arg7[%c20_53, %c0_54], %51 {strides = array<i32>} : memref<36x288xbf16, #tpu.memory_space<vmem>>, vector<4x288xbf16>,
    %c0_55 = arith.constant 0 : index
    %c36 = arith.constant 36 : index
    %53 = vector.load %arg8[%c0_55, %c36] : memref<4x342xbf16, #tpu.memory_space<vmem>>, vector<4x288xbf16>
    %c24_56 = arith.constant 24 : index
    %c0_57 = arith.constant 0 : index
    %54 = vector.load %arg7[%c24_56, %c0_57] : memref<36x288xbf16, #tpu.memory_space<vmem>>, vector<4x288xbf16>
    tpu.vector_store %arg7[%c24_56, %c0_57], %53 {strides = array<i32>} : memref<36x288xbf16, #tpu.memory_space<vmem>>, vector<4x288xbf16>,
    %c0_58 = arith.constant 0 : index
    %c37 = arith.constant 37 : index
    %55 = vector.load %arg8[%c0_58, %c37] : memref<4x342xbf16, #tpu.memory_space<vmem>>, vector<4x288xbf16>
    %c28_59 = arith.constant 28 : index
    %c0_60 = arith.constant 0 : index
    %56 = vector.load %arg7[%c28_59, %c0_60] : memref<36x288xbf16, #tpu.memory_space<vmem>>, vector<4x288xbf16>
    tpu.vector_store %arg7[%c28_59, %c0_60], %55 {strides = array<i32>} : memref<36x288xbf16, #tpu.memory_space<vmem>>, vector<4x288xbf16>,
    %c0_61 = arith.constant 0 : index
    %c38 = arith.constant 38 : index
    %57 = vector.load %arg8[%c0_61, %c38] : memref<4x342xbf16, #tpu.memory_space<vmem>>, vector<4x288xbf16>
    %c32_62 = arith.constant 32 : index
    %c0_63 = arith.constant 0 : index
    %58 = vector.load %arg7[%c32_62, %c0_63] : memref<36x288xbf16, #tpu.memory_space<vmem>>, vector<4x288xbf16>
    tpu.vector_store %arg7[%c32_62, %c0_63], %57 {strides = array<i32>} : memref<36x288xbf16, #tpu.memory_space<vmem>>, vector<4x288xbf16>,
    %c0_64 = arith.constant 0 : index
    %c1_65 = arith.constant 1 : index
    %c0_66 = arith.constant 0 : index
    %c0_67 = arith.constant 0 : index
    %59 = vector.load %arg3[%c0_64, %c1_65, %c0_66, %c0_67] : memref<1x2x4x36xbf16, #tpu.memory_space<vmem>>, vector<1x1x4x36xbf16>
    %60 = vector.shape_cast %59 : vector<1x1x4x36xbf16> to vector<4x36xbf16>
    %c0_68 = arith.constant 0 : index
    %c0_69 = arith.constant 0 : index
    %61 = vector.load %arg7[%c0_68, %c0_69] : memref<36x288xbf16, #tpu.memory_space<vmem>>, vector<36x288xbf16>
    %cst_70 = arith.constant dense<0.000000e+00> : vector<4x288xf32>
    %62 = tpu.matmul %60, %61, %cst_70 {dimension_numbers = #tpu.dot_dimension_numbers<[1], [0], [0], [1], [0, 0, 1, 1], [], []>} : vector<4x36xbf16>, vector<36x288xbf16>, vector<4x288xf32> -> vector<4x288xf32>
    %63 = vector.extract_strided_slice %1 {offsets = [0, 19], sizes = [4, 288], strides = [1, 1]} : vector<4x342xbf16> to vector<4x288xbf16>
    %64 = arith.extf %63 : vector<4x288xbf16> to vector<4x288xf32>
    %c0_71 = arith.constant 0 : index
    %c2_72 = arith.constant 2 : index
    %c0_73 = arith.constant 0 : index
    %c0_74 = arith.constant 0 : index
    %65 = vector.load %arg4[%c0_71, %c2_72, %c0_73, %c0_74] : memref<1x4x4x1xf32, #tpu.memory_space<vmem>>, vector<1x1x4x1xf32>
    %66 = vector.shape_cast %65 : vector<1x1x4x1xf32> to vector<4x1xf32>
    %67 = vector.broadcast %66 : vector<4x1xf32> to vector<4x288xf32>
    %68 = arith.mulf %62, %67 : vector<4x288xf32>
    %c0_75 = arith.constant 0 : index
    %c3 = arith.constant 3 : index
    %c0_76 = arith.constant 0 : index
    %c0_77 = arith.constant 0 : index
    %69 = vector.load %arg4[%c0_75, %c3, %c0_76, %c0_77] : memref<1x4x4x1xf32, #tpu.memory_space<vmem>>, vector<1x1x4x1xf32>
    %70 = vector.shape_cast %69 : vector<1x1x4x1xf32> to vector<4x1xf32>
    %71 = vector.broadcast %70 : vector<4x1xf32> to vector<4x288xf32>
    %72 = arith.addf %68, %71 : vector<4x288xf32>
    %73 = arith.addf %72, %64 : vector<4x288xf32>
    %cst_78 = arith.constant 0.000000e+00 : f32
    %74 = vector.broadcast %cst_78 : f32 to vector<4x288xf32>
    %75 = arith.maximumf %73, %74 : vector<4x288xf32>
    %c0_79 = arith.constant 0 : index
    %c0_80 = arith.constant 0 : index
    %c0_81 = arith.constant 0 : index
    %c0_82 = arith.constant 0 : index
    %76 = vector.load %arg6[%c0_79, %c0_80, %c0_81, %c0_82] : memref<1x1x4x288xf32, #tpu.memory_space<vmem>>, vector<1x1x4x288xf32>
    %77 = vector.shape_cast %76 : vector<1x1x4x288xf32> to vector<4x288xf32>
    %78 = vector.shape_cast %75 : vector<4x288xf32> to vector<1x1x4x288xf32>
    tpu.vector_store %arg6[%c0_79, %c0_80, %c0_81, %c0_82], %78 {strides = array<i32>} : memref<1x1x4x288xf32, #tpu.memory_space<vmem>>, vector<1x1x4x288xf32>,
    return
  }
  func.func @transform_0(%arg0: i32, %arg1: i32) -> (i32, i32, i32, i32) {
    %c0_i32 = arith.constant 0 : i32
    %c0_i32_0 = arith.constant 0 : i32
    %c0_i32_1 = arith.constant 0 : i32
    return %arg0, %arg1, %c0_i32, %c0_i32_0 : i32, i32, i32, i32
  }
  func.func @transform_1(%arg0: i32, %arg1: i32) -> (i32, i32, i32, i32) {
    %c0_i32 = arith.constant 0 : i32
    %c0_i32_0 = arith.constant 0 : i32
    %c0_i32_1 = arith.constant 0 : i32
    %c0_i32_2 = arith.constant 0 : i32
    return %arg0, %c0_i32, %c0_i32_0, %c0_i32_1 : i32, i32, i32, i32
  }
  func.func @transform_2(%arg0: i32, %arg1: i32) -> (i32, i32, i32, i32) {
    %c0_i32 = arith.constant 0 : i32
    %c0_i32_0 = arith.constant 0 : i32
    %c0_i32_1 = arith.constant 0 : i32
    %c0_i32_2 = arith.constant 0 : i32
    return %arg0, %c0_i32, %c0_i32_0, %c0_i32_1 : i32, i32, i32, i32
  }
  func.func @transform_3(%arg0: i32, %arg1: i32) -> (i32, i32) {
    %c0_i32 = arith.constant 0 : i32
    %c0_i32_0 = arith.constant 0 : i32
    %c0_i32_1 = arith.constant 0 : i32
    return %c0_i32, %c0_i32_0 : i32, i32
  }
  func.func @transform_4(%arg0: i32, %arg1: i32) -> (i32, i32, i32, i32) {
    %c0_i32 = arith.constant 0 : i32
    %c0_i32_0 = arith.constant 0 : i32
    %c0_i32_1 = arith.constant 0 : i32
    return %arg0, %arg1, %c0_i32, %c0_i32_0 : i32, i32, i32, i32
  }
}

</mosaic_0001>

<bundles_post_ra>
// kernel: tpu_custom_call.1
= control target key start
LH: loop header
LB: loop body
LE: loop exit
PB: predicated region body
PF: predicated region fallthrough
CT: control target
= control target key end

     0   :  { %9 = vsyncpa [#allocation5], 0  ;;  %s1621_s0 = inlined_call_operand.vmem [shape: bf16[2,2,4,342], index: 0, kind: input, shape index: {}]   ;;  %s1622_s1 = inlined_call_operand.vmem [shape: bf16[2,2,4,36], index: 1, kind: input, shape index: {}]   ;;  %s1623_s2 = inlined_call_operand.vmem [shape: f32[2,4,4,1], index: 2, kind: input, shape index: {}]   ;;  %s1624_s3 = inlined_call_operand.vmem [shape: f32[1,288], index: 3, kind: input, shape index: {}]   ;;  %s1625_s4 = inlined_call_operand.hbm [shape: f32[2,2,4,288], index: 4, kind: output, shape index: {}]  }
   0x1   :  { %11 = vsyncpa [#allocation5 + $0x1], 0  ;;  %s1349_s15 = smov 0   ;;  %s1351_s16 = smov 0  }
   0x2   :  { %s1353_s17 = smov 0   ;;  %s1355_s18 = smov 0  }
   0x3   :  { %s1357_s19 = smov 0   ;;  %s1359_s20 = smov 0  }
   0x4   :  { %s1361_s21 = smov 0   ;;  %s1363_s22 = smov 0  }
   0x5 LB: > { %s1044_s23 = sadd.s32 4294967295, %s1312_s22   ;;  %s1045_s24 = sadd.s32 4294967294, %s1312_s22   ;;  %s1312_s22 = sphi %s1363_s22, %s17_s22   ;;  %s1308_s21 = sphi %s1361_s21, %s1647_s21   ;;  %s1304_s20 = sphi %s1359_s20, %s1646_s20   ;;  %s1300_s19 = sphi %s1357_s19, %s1645_s19   ;;  %s1296_s18 = sphi %s1355_s18, %s1644_s18   ;;  %s1292_s17 = sphi %s1353_s17, %s1643_s17   ;;  %s1288_s16 = sphi %s1351_s16, %s1642_s16   ;;  %s1284_s15 = sphi %s1349_s15, %s1641_s15  }
   0x6   : > { %s26_s25 = sadd.s32 1, %s1304_s20  ;;  %s29_s26 = sadd.s32 1, %s1308_s21 }
   0x7   : > { %p27_p0 = scmp.ge.s32.totalorder %s26_s25, 2  ;;  %p149_p1 = scmp.ne.s32.totalorder %s1292_s17, %s1288_s16 }
   0x8   : > { %p150_p2 = scmp.eq.s32.totalorder %s1044_s23, 3  ;;  %p155_p5 = scmp.ne.s32.totalorder %s1288_s16, %s1284_s15 }
   0x9   : > { %s1649_s25 = smov (%p27_p0, %s26_s25), 0  ;;  %s1651_s26 = smov (!%p27_p0, %s29_s26), %s1308_s21 }
   0xa   : > { %s135_s27 = ssub.s32 %s1304_s20, %s1649_s25  ;;  %p1400_p3 = por %p150_p2, %p149_p1 }
   0xb   : > { %p31_p4 = scmp.ge.s32.totalorder %s1651_s26, 2  ;;  %p156_p6 = scmp.eq.s32.totalorder %s1045_s24, 3 }
   0xc   : > { %p1048_p7 = scmp.ge.s32.totalorder %s1312_s22, 1  ;;  %p205_p9 = scmp.lt.s32.totalorder %s1312_s22, 5 }
   0xd   : > { %s1653_s26 = smov (%p31_p4, %s1651_s26), 0  ;;  %p1409_p8 = por %p156_p6, %p155_p5 }
   0xe   : > { %s134_s30 = ssub.s32 %s1308_s21, %s1653_s26  ;;  %s139_s5 = sadd.s32 1, %s1292_s17 }
   0xf   : > { %s136_s6 = sor.u32 %s135_s27, %s134_s30  ;;  %p206_p10 = pnand %p1048_p7, %p205_p9 }
  0x10   : > { %p137_p11 = scmp.eq.s32.totalorder %s136_s6, 0  ;;  %p245_p12 = scmp.lt.s32.totalorder (!%p206_p10), %s1300_s19, 1 }
  0x11   : > { %209 = sbr.rel (%p206_p10) target bundleno = 890 (0x37a), region = 36  ;;  %p247_p13 = scmp.lt.s32.totalorder (!%p206_p10), %s1296_s18, 1 }
  0x12   : > { %s1418_s7 = scalar_select %p137_p11, %s1292_s17, %s139_s5  }
  0x13   : > { %s1314_s27 = smov (!%p206_p10), 127   ;;  %s1626_s30 = smov (!%p206_p10), 126  }
  0x14   : > { %s1316_s5 = smov (!%p206_p10), 109   ;;  %s1317_s6 = smov (!%p206_p10), 108  }
  0x15   : > { %s1323_s14 = smov (!%p206_p10), 19  }
  0x16   : > { %s1423_s8 = scalar_select %p245_p12, %s1300_s19, 1  ;;  %vm273_vm0 = vcmask 254976   ;;  %vm294_vm1 = vcmask 257026   ;;  %vm287_vm2 = vcmask 1043456   ;;  %vm345_vm3 = vcmask 891904  }
  0x17   : > { %s248_s9 = scalar_select %p247_p13, %s1296_s18, 1  ;;  %vm382_vm4 = vcmask 752640   ;;  %vm364_vm5 = vcmask 883712   ;;  %vm1630_vm6 = vcmask 1031168   ;;  %vm289_vm7 = vcmask 1039360  }
  0x18   : > { %s1131_s10 = smul.u32 6, %s1423_s8  ;;  %vm401_vm8 = vcmask 744448   ;;  %vm1631_vm9 = vcmask 736256   ;;  %vm480_vm10 = vcmask 1041408   ;;  %vm1628_vm11 = vcmask 900096  }
  0x19   : > { %s1130_s11 = smul.u32 3, %s248_s9  ;;  %s1318_s9 = smov 92   ;;  %vm1629_vm12 = vcmask 293888   ;;  %vm562_vm13 = vcmask 1043458   ;;  %vm564_vm14 = vcmask 701444  }
  0x1a   : > { %vm563_vm15 = vmor %vm562_vm13, %vm480_vm10 }
  0x1b   : > { %s251_s12 = sadd.s32 %s1131_s10, %s1130_s11  ;;  %s1319_s10 = smov 91  }
  0x1c   : > { %s1049_s13 = sshll.u32 %s251_s12, 1  ;;  %s1320_s11 = smov 90  }
  0x1d   : > { %s253_s24 = scalar_lea.vmem %s1621_s0, %s1049_s13  ;;  %s1321_s12 = smov 110  }
  0x1e   : > { %v1430_v0 = vld [vmem:[%s253_s24] sm:$0x3f]  ;;  %s1116_s13 = sshll.u32 %s1423_s8, 4 }
  0x1f   : > { %267 = vst [vmem:[#allocation1] ss:$2 sm:$0xff] %v1430_v0  ;;  %s1481_s24 = scalar_lea.vmem %s1623_s2, %s1116_s13  ;;  %s1115_s13 = sshll.u32 %s1423_s8, 2 }
  0x20   : > { %v529_v61 = vld [vmem:[%s1481_s24] sm:$0xf]  ;;  %v1081_v62 = vld [vmem:[%s1481_s24 + $0x4] sm:$0xf] }
  0x26   : > { %v268_v1 = vld.sshfl [vmem:[#allocation1] sm:$0xff pattern:$0x75643120]  ;;  %v269_v2 = vld.sshfl [vmem:[#allocation1 + $0x8] sm:$0xff pattern:$0x75643120] }
  0x27   : > { %276 = vst [vmem:[#allocation1 + $0x1] ss:$2 sm:$0xff] %v1430_v0 }
  0x28   : > { %272 = vst [vmem:[#allocation2] sm:$0x33] %v268_v1 }
  0x29   : > { %274 = vst.msk [vmem:[#allocation2 + $0x8] sm:$0x3] %vm273_vm0, %v269_v2  ;;  %v1322_v2 = vmov 0  }
  0x2a   : > { %1215 = vset.pattern.permute.xlu1 %v1322_v2  ;;  %1216 = vset.pattern.permute.xlu2 %v1322_v2 }
  0x2b   : > { %1217 = vset.pattern.permute.xlu0 %v1322_v2 }
  0x2e   : > { %v279_v3 = vld.sshfl [vmem:[#allocation1 + $0x8] sm:$0xff pattern:$0x75643120]  ;;  %v277_v4 = vld.sshfl [vmem:[#allocation1] sm:$0xff pattern:$0x75643120] }
  0x2f   : > { %283 = vrot.lane.b32.xlu1 %v279_v3, %s1314_s27  ;;  %296 = vst [vmem:[#allocation1] ss:$2 sm:$0xff] %v1430_v0 }
  0x36   : > { %v297_v5 = vld.sshfl [vmem:[#allocation1] sm:$0xff pattern:$0x75643120]  ;;  %v299_v6 = vld.sshfl [vmem:[#allocation1 + $0x8] sm:$0xff pattern:$0x75643120] }
  0x37   : > { %315 = vst [vmem:[#allocation1 + $0x1] ss:$2 sm:$0xff] %v1430_v0  ;;  %303 = vrot.lane.b32.xlu2 %v299_v6, %s1626_s30 }
  0x3e   : > { %v316_v7 = vld.sshfl [vmem:[#allocation1] sm:$0xff pattern:$0x75643120]  ;;  %v318_v8 = vld.sshfl [vmem:[#allocation1 + $0x8] sm:$0xff pattern:$0x75643120] }
  0x3f   : > { %333 = vst [vmem:[#allocation1] ss:$2 sm:$0xff] %v1430_v0 }
  0x46   : > { %v336_v9 = vld.sshfl [vmem:[#allocation1 + $0x8] sm:$0xff pattern:$0x75643120]  ;;  %v334_v10 = vld.sshfl [vmem:[#allocation1] sm:$0xff pattern:$0x75643120] }
  0x47   : > { %340 = vrot.lane.b32.xlu1 %v336_v9, %s1316_s5  ;;  %352 = vst [vmem:[#allocation1 + $0x1] ss:$2 sm:$0xff] %v1430_v0  ;;  %338 = vrot.lane.b32.xlu0 %v334_v10, %s1316_s5 }
  0x4e   : > { %v355_v11 = vld.sshfl [vmem:[#allocation1 + $0x8] sm:$0xff pattern:$0x75643120]  ;;  %v353_v12 = vld.sshfl [vmem:[#allocation1] sm:$0xff pattern:$0x75643120] }
  0x4f   : > { %359 = vrot.lane.b32.xlu1 %v355_v11, %s1317_s6  ;;  %370 = vst [vmem:[#allocation1] ss:$2 sm:$0xff] %v1430_v0 }
  0x56   : > { %v373_v13 = vld.sshfl [vmem:[#allocation1 + $0x8] sm:$0xff pattern:$0x75643120]  ;;  %v371_v14 = vld.sshfl [vmem:[#allocation1] sm:$0xff pattern:$0x75643120] }
  0x57   : > { %357 = vrot.lane.b32.xlu1 %v353_v12, %s1317_s6  ;;  %377 = vrot.lane.b32.xlu2 %v373_v13, %s1318_s9  ;;  %389 = vst [vmem:[#allocation1 + $0x1] ss:$2 sm:$0xff] %v1430_v0 }
  0x5e   : > { %v390_v15 = vld.sshfl [vmem:[#allocation1] sm:$0xff pattern:$0x75643120]  ;;  %v392_v16 = vld.sshfl [vmem:[#allocation1 + $0x8] sm:$0xff pattern:$0x75643120] }
  0x5f   : > { %281 = vrot.lane.b32.xlu1 %v277_v4, %s1314_s27  ;;  %394 = vrot.lane.b32.xlu0 %v390_v15, %s1319_s10  ;;  %407 = vst [vmem:[#allocation1] ss:$2 sm:$0xff] %v1430_v0 }
  0x60   : > { %375 = vrot.lane.b32.xlu2 %v371_v14, %s1318_s9 }
  0x66   : > { %v410_v17 = vld.sshfl [vmem:[#allocation1 + $0x8] sm:$0xff pattern:$0x75643120]  ;;  %v408_v18 = vld.sshfl [vmem:[#allocation1] sm:$0xff pattern:$0x75643120] }
  0x67   : > { %414 = vrot.lane.b32.xlu0 %v410_v17, %s1320_s11  ;;  %532 = vperm.xlu1 %1215, %v529_v61  }
  0x68   : > { %396 = vrot.lane.b32.xlu2 %v392_v16, %s1319_s10 }
  0x6f   : > { %412 = vrot.lane.b32.xlu0 %v408_v18, %s1320_s11 }
  0x70   : > { %301 = vrot.lane.b32.xlu2 %v297_v5, %s1626_s30  ;;  %s1498_s30 = scalar_lea.vmem %s1622_s1, %s1115_s13 }
  0x77   : > { %322 = vrot.lane.b32.xlu0 %v318_v8, %s1321_s12 }
  0x78   : > { %542 = vperm.xlu2 %1216, %v1081_v62  }
  0x7f   : > { %320 = vrot.lane.b32.xlu0 %v316_v7, %s1321_s12 }
  0x91   : > { %v304_v19 = vpop.permute.xlu2 %303 }
  0x92   : > { %313 = vst.msk [vmem:[#allocation2 + $0x14] sm:$0x3] %vm273_vm0, %v304_v19  ;;  %v306_v36 = vrot.slane %v304_v19, 4 }
  0xa1   : > { %v284_v20 = vpop.permute.xlu1 %283 }
  0xa2   : > { %295 = vst.msk [vmem:[#allocation2 + $0x8] sm:$0xc] %vm294_vm1, %v284_v20  ;;  %v286_v45 = vrot.slane %v284_v20, 4 }
  0xa9   : > { %v1064_v14 = vld [vmem:[#allocation2 + $0x8] sm:$0xf] }
  0xb1   : > { %v378_v21 = vpop.permute.xlu2 %377 }
  0xb2   : > { %387 = vst.msk [vmem:[#allocation2 + $0x2c] sm:$0x3] %vm273_vm0, %v378_v21  ;;  %v380_v23 = vrot.slane %v378_v21, 4 }
  0xb9   : > { %v341_v22 = vpop.permute.xlu1 %340  ;;  %v339_v24 = vpop.permute.xlu0 %338 }
  0xba   : > { %v343_v25 = vrot.slane %v341_v22, 4  ;;  %350 = vst.msk [vmem:[#allocation2 + $0x20] sm:$0x3] %vm273_vm0, %v341_v22  ;;  %v376_v26 = vpop.permute.xlu2 %375  ;;  %v342_v27 = vrot.slane %v339_v24, 4 }
  0xbb   : > { %v379_v28 = vrot.slane %v376_v26, 4 }
  0xbc   : > { %v344_v29 = vsel %vm287_vm2, %v342_v27, %v343_v25 }
  0xbd   : > { %v381_v30 = vsel %vm287_vm2, %v379_v28, %v380_v23  ;;  %v346_v31 = vsel %vm345_vm3, %v339_v24, %v344_v29 }
  0xbe   : > { %v383_v32 = vsel %vm382_vm4, %v376_v26, %v381_v30  ;;  %349 = vst [vmem:[#allocation2 + $0x18] sm:$0x33] %v346_v31  ;;  %v425_v30 = vld [vmem:[%s1498_s30] sm:$0x3] }
  0xbf   : > { %386 = vst [vmem:[#allocation2 + $0x24] sm:$0x33] %v383_v32 }
  0xc1   : > { %v360_v33 = vpop.permute.xlu1 %359 }
  0xc2   : > { %369 = vst.msk [vmem:[#allocation2 + $0x20] sm:$0xc] %vm294_vm1, %v360_v33  ;;  %v397_v34 = vpop.permute.xlu2 %396  ;;  %v362_v35 = vrot.slane %v360_v33, 4 }
  0xc3   : > { %406 = vst.msk [vmem:[#allocation2 + $0x2c] sm:$0xc] %vm294_vm1, %v397_v34  ;;  %v399_v46 = vrot.slane %v397_v34, 4 }
  0xc9   : > { %v358_v37 = vpop.permute.xlu1 %357  ;;  %v1076_v4 = vld [vmem:[#allocation2 + $0x20] sm:$0xf] }
  0xca   : > { %v361_v38 = vrot.slane %v358_v37, 4  ;;  %v302_v39 = vpop.permute.xlu2 %301  ;;  %v1122_v6 = vld [vmem:[#allocation2 + $0x28] sm:$0xf0] }
  0xcb   : > { %v305_v40 = vrot.slane %v302_v39, 4  ;;  %v1077_v8 = vor.u32 %v1122_v6, %v1076_v4 }
  0xcc   : > { %v363_v41 = vsel %vm287_vm2, %v361_v38, %v362_v35 }
  0xcd   : > { %v365_v42 = vsel %vm364_vm5, %v358_v37, %v363_v41  ;;  %v307_v43 = vsel %vm287_vm2, %v305_v40, %v306_v36 }
  0xce   : > { %368 = vst [vmem:[#allocation2 + $0x18] sm:$0xcc] %v365_v42  ;;  %v309_v44 = vsel %vm1630_vm6, %v302_v39, %v307_v43  ;;  %v551_v39 = vld [vmem:[%s1624_s3] sm:$0x7]  ;;  %vm587_vm6 = vcmask 154624  }
  0xcf   : > { %312 = vst [vmem:[#allocation2 + $0xc] sm:$0x33] %v309_v44  ;;  %v555_v42 = vperm.slane %v551_v39, 2 }
  0xd1   : > { %v282_v47 = vpop.permute.xlu1 %281  ;;  %v395_v48 = vpop.permute.xlu0 %394 }
  0xd2   : > { %v285_v49 = vrot.slane %v282_v47, 4  ;;  %v398_v50 = vrot.slane %v395_v48, 4  ;;  %v543_v40 = vpop.permute.xlu2 %542 }
  0xd4   : > { %v288_v51 = vsel %vm287_vm2, %v285_v49, %v286_v45  ;;  %v400_v52 = vsel %vm287_vm2, %v398_v50, %v399_v46  ;;  %v553_v50 = vperm.slane %v551_v39, 0 }
  0xd5   : > { %v290_v53 = vsel %vm289_vm7, %v282_v47, %v288_v51  ;;  %v402_v54 = vsel %vm401_vm8, %v395_v48, %v400_v52  ;;  %v1068_v25 = vld [vmem:[#allocation2 + $0x18] sm:$0xf]  ;;  %v1120_v26 = vld [vmem:[#allocation2 + $0x1c] sm:$0xf]  ;;  %v554_v51 = vperm.slane %v551_v39, 1 }
  0xd6   : > { %293 = vst [vmem:[#allocation2] sm:$0xcc] %v290_v53 }
  0xd7   : > { %405 = vst [vmem:[#allocation2 + $0x24] sm:$0xcc] %v402_v54 }
  0xd9   : > { %v415_v55 = vpop.permute.xlu0 %414  ;;  %v533_v37 = vpop.permute.xlu1 %532 }
  0xda   : > { %424 = vst.msk [vmem:[#allocation2 + $0x38] sm:$0x3] %vm273_vm0, %v415_v55  ;;  %v417_v58 = vrot.slane %v415_v55, 4 }
  0xdd   : > { %v1056_v31 = vld [vmem:[#allocation2] sm:$0xf]  ;;  %v1117_v33 = vld [vmem:[#allocation2 + $0x4] sm:$0xf] }
  0xde   : > { %v1121_v18 = vld [vmem:[#allocation2 + $0x20] sm:$0xf0]  ;;  %v1070_v23 = vld [vmem:[#allocation2 + $0x24] sm:$0xf0] }
  0xdf   : > { %v1069_v28 = vor.u32 %v1121_v18, %v1068_v25  ;;  %v1073_v29 = vor.u32 %v1120_v26, %v1070_v23 }
  0xe1   : > { %v413_v56 = vpop.permute.xlu0 %412  ;;  %v435_v57 = vld [vmem:[#allocation2 + $0x38] sm:$0x3] }
  0xe2   : > { %v416_v59 = vrot.slane %v413_v56, 4  ;;  %v460_v60 = vunpack.c.l.b16 %v435_v57 }
  0xe4   : > { %v418_v63 = vsel %vm287_vm2, %v416_v59, %v417_v58  ;;  %v469_v1 = vpack.c.b16 %v460_v60, %v460_v60 }
  0xe5   : > { %v420_v3 = vsel %vm1631_vm9, %v413_v56, %v418_v63 }
  0xe6   : > { %423 = vst [vmem:[#allocation2 + $0x30] sm:$0x33] %v420_v3  ;;  %v488_v5 = vsel %vm480_vm10, %v469_v1, 0 }
  0xe7   : > { %521 = vmatpush.bf16.msra.mxu2 %v488_v5 }
  0xe9   : > { %v323_v7 = vpop.permute.xlu0 %322 }
  0xea   : > { %332 = vst.msk [vmem:[#allocation2 + $0x14] sm:$0xc] %vm294_vm1, %v323_v7  ;;  %v325_v15 = vrot.slane %v323_v7, 4 }
  0xeb   : > { %522 = vmatpush.bf16.msra.mxu2 %v1077_v8 }
  0xed   : > { %v434_v9 = vld [vmem:[#allocation2 + $0x30] sm:$0x33] }
  0xee   : > { %v458_v10 = vunpack.c.l.b16 %v434_v9  ;;  %v459_v11 = vunpack.c.h.b16 %v434_v9 }
  0xf0   : > { %v467_v12 = vpack.c.b16 %v458_v10, %v458_v10  ;;  %v468_v13 = vpack.c.b16 %v459_v11, %v459_v11 }
  0xf1   : > { %v321_v16 = vpop.permute.xlu0 %320  ;;  %v1119_v17 = vld [vmem:[#allocation2 + $0x10] sm:$0xf0] }
  0xf2   : > { %v324_v19 = vrot.slane %v321_v16, 4  ;;  %v482_v20 = vsel %vm480_vm10, %v467_v12, 0  ;;  %v485_v21 = vsel %vm480_vm10, %v468_v13, 0  ;;  %v1065_v22 = vor.u32 %v1119_v17, %v1064_v14 }
  0xf3   : > { %495 = vmatpush.bf16.msra.mxu0 %v482_v20  ;;  %508 = vmatpush.bf16.msra.mxu1 %v485_v21 }
  0xf4   : > { %v326_v24 = vsel %vm287_vm2, %v324_v19, %v325_v15  ;;  %523 = vmatpush.bf16.msra.mxu2 %v1065_v22 }
  0xf5   : > { %v328_v27 = vsel %vm1628_vm11, %v321_v16, %v326_v24  ;;  %vm565_vm11 = vmor %vm564_vm14, %vm563_vm15  ;;  %vm590_vm14 = vcmask 1041560  }
  0xf6   : > { %331 = vst [vmem:[#allocation2 + $0xc] sm:$0xcc] %v328_v27  ;;  %vm591_vm15 = vmor %vm562_vm13, %vm590_vm14 }
  0xf7   : > { %496 = vmatpush.bf16.msra.mxu0 %v1069_v28  ;;  %509 = vmatpush.bf16.msra.mxu1 %v1073_v29  ;;  %566 = vst.msk [vmem:[#allocation3] sm:$0x3f] %vm565_vm11, %v1322_v2  ;;  %vm577_vm11 = vcmask 1045508  }
  0xf8   : > { %1080 = vmatmul.msk.bf16.vlgmr.msra.gmra.mxu2 %vm1629_vm12, %v425_v30 }
  0xfd   : > { %v1118_v32 = vld [vmem:[#allocation2 + $0x8] sm:$0xf0]  ;;  %v1058_v34 = vld [vmem:[#allocation2 + $0xc] sm:$0xf0] }
  0xfe   : > { %v1057_v35 = vor.u32 %v1118_v32, %v1056_v31  ;;  %v1061_v36 = vor.u32 %v1117_v33, %v1058_v34  ;;  %v863_v34 = vunpack.c.l.bf16 %v1430_v0 }
 0x100   : > { %497 = vmatpush.bf16.msra.mxu0 %v1057_v35  ;;  %510 = vmatpush.bf16.msra.mxu1 %v1061_v36 }
 0x103   : > { %1078 = vmatmul.msk.bf16.vlgmr.msra.gmra.mxu0 %vm1629_vm12, %v425_v30  ;;  %1079 = vmatmul.msk.bf16.vlgmr.msra.gmra.mxu1 %vm1629_vm12, %v425_v30  ;;  %vm592_vm12 = vcmask 414724  }
 0x104   : > { %vm593_vm9 = vmor %vm592_vm12, %vm591_vm15 }
 0x17b   : > { %v525_v38 = vpop.f32.mrf.mxu2 }
 0x17c   : > { %v537_v41 = vmul.f32 %v533_v37, %v525_v38  ;;  %v1110_v38 = vld [vmem:[%s1481_s24 + $0x8] sm:$0xf] }
 0x17e   : > { %v547_v43 = vadd.f32 %v543_v40, %v537_v41 }
 0x180   : > { %v499_v44 = vpop.f32.mrf.mxu0  ;;  %v512_v45 = vpop.f32.mrf.mxu1  ;;  %v550_v46 = vmax.f32 %v547_v43, 0.0 }
 0x181   : > { %v535_v47 = vmul.f32 %v533_v37, %v499_v44  ;;  %v536_v48 = vmul.f32 %v533_v37, %v512_v45  ;;  %v864_v37 = vunpack.c.h.bf16 %v1430_v0 }
 0x182   : > { %v561_v49 = vmul.f32 %v555_v42, %v550_v46 }
 0x183   : > { %v545_v52 = vadd.f32 %v543_v40, %v535_v47  ;;  %v546_v53 = vadd.f32 %v543_v40, %v536_v48  ;;  %v527_v54 = vpop.f32.mrf.mxu2  ;;  %889 = vst [vmem:[#allocation1 + $0x10] ss:$2 sm:$0xff] %v864_v37 }
 0x184   : > { %v568_v55 = vpack.c.bf16 %v561_v49, %v561_v49 }
 0x185   : > { %v548_v56 = vmax.f32 %v545_v52, 0.0  ;;  %v549_v57 = vmax.f32 %v546_v53, 0.0 }
 0x186   : > { %v572_v60 = vrot.slane %v568_v55, 4  ;;  %v573_v61 = vrot.slane %v568_v55, 6 }
 0x187   : > { %v559_v58 = vmul.f32 %v553_v50, %v548_v56  ;;  %v560_v59 = vmul.f32 %v554_v51, %v549_v57 }
 0x188   : > { %v501_v62 = vpop.f32.mrf.mxu0  ;;  %v514_v63 = vpop.f32.mrf.mxu1  ;;  %v580_v3 = vsel %vm577_vm11, %v572_v60, %v573_v61 }
 0x189   : > { %v567_v1 = vpack.c.bf16 %v560_v59, %v559_v58 }
 0x18a   : > { %v892_v40 = vld.sshfl [vmem:[#allocation1 + $0x10] sm:$0xff pattern:$0x75316420] }
 0x18b   : > { %v571_v2 = vrot.slane %v567_v1, 2 }
 0x18d   : > { %v576_v4 = vsel %vm480_vm10, %v567_v1, %v571_v2 }
 0x18e   : > { %v582_v5 = vsel %vm287_vm2, %v576_v4, %v580_v3 }
 0x18f   : > { %584 = vrot.lane.b32.xlu0 %v582_v5, %s1323_s14 }
 0x201   : > { %v585_v6 = vpop.permute.xlu0 %584 }
 0x202   : > { %v586_v7 = vrot.slane %v585_v6, 6 }
 0x204   : > { %v588_v8 = vsel %vm587_vm6, %v586_v7, %v585_v6 }
 0x205   : > { %594 = vst.msk [vmem:[#allocation3] sm:$0x3f] %vm593_vm9, %v588_v8 }
 0x20c   : > { %v595_v9 = vld [vmem:[#allocation3] sm:$0x3f] }
 0x20d   : > { %597 = vst [vmem:[#allocation1] ss:$2 sm:$0xff] %v595_v9  ;;  %v604_v10 = vld [vmem:[#allocation3] sm:$0x3f] }
 0x20e   : > { %v624_v13 = vld [vmem:[#allocation3] sm:$0x3f] }
 0x20f   : > { %v643_v16 = vld [vmem:[#allocation3] sm:$0x3f] }
 0x210   : > { %v663_v19 = vld [vmem:[#allocation3] sm:$0x3f] }
 0x211   : > { %v682_v22 = vld [vmem:[#allocation3] sm:$0x3f] }
 0x212   : > { %v702_v25 = vld [vmem:[#allocation3] sm:$0x3f] }
 0x213   : > { %v721_v28 = vld [vmem:[#allocation3] sm:$0x3f] }
 0x214   : > { %v598_v11 = vld.sshfl [vmem:[#allocation1] sm:$0xff pattern:$0x75643120]  ;;  %v599_v12 = vld.sshfl [vmem:[#allocation1 + $0x8] sm:$0xff pattern:$0x75643120] }
 0x215   : > { %607 = vst [vmem:[#allocation1 + $0x1] ss:$2 sm:$0xff] %v604_v10  ;;  %v741_v31 = vld [vmem:[#allocation3] sm:$0x3f] }
 0x216   : > { %602 = vst [vmem:[#allocation2] sm:$0x33] %v598_v11 }
 0x217   : > { %603 = vst.msk [vmem:[#allocation2 + $0x8] sm:$0x3] %vm273_vm0, %v599_v12 }
 0x21c   : > { %v608_v14 = vld.sshfl [vmem:[#allocation1] sm:$0xff pattern:$0x75643120]  ;;  %v610_v15 = vld.sshfl [vmem:[#allocation1 + $0x8] sm:$0xff pattern:$0x75643120] }
 0x21d   : > { %626 = vst [vmem:[#allocation1] ss:$2 sm:$0xff] %v624_v13 }
 0x224   : > { %v627_v17 = vld.sshfl [vmem:[#allocation1] sm:$0xff pattern:$0x75643120]  ;;  %v629_v18 = vld.sshfl [vmem:[#allocation1 + $0x8] sm:$0xff pattern:$0x75643120] }
 0x225   : > { %646 = vst [vmem:[#allocation1 + $0x1] ss:$2 sm:$0xff] %v643_v16 }
 0x22c   : > { %v647_v20 = vld.sshfl [vmem:[#allocation1] sm:$0xff pattern:$0x75643120]  ;;  %v649_v21 = vld.sshfl [vmem:[#allocation1 + $0x8] sm:$0xff pattern:$0x75643120] }
 0x22d   : > { %665 = vst [vmem:[#allocation1] ss:$2 sm:$0xff] %v663_v19  ;;  %v1111_v19 = vld [vmem:[%s1481_s24 + $0xc] sm:$0xf] }
 0x234   : > { %v668_v23 = vld.sshfl [vmem:[#allocation1 + $0x8] sm:$0xff pattern:$0x75643120]  ;;  %v666_v24 = vld.sshfl [vmem:[#allocation1] sm:$0xff pattern:$0x75643120] }
 0x235   : > { %672 = vrot.lane.b32.xlu1 %v668_v23, %s1316_s5  ;;  %670 = vrot.lane.b32.xlu0 %v666_v24, %s1316_s5  ;;  %685 = vst [vmem:[#allocation1 + $0x1] ss:$2 sm:$0xff] %v682_v22 }
 0x23c   : > { %v688_v26 = vld.sshfl [vmem:[#allocation1 + $0x8] sm:$0xff pattern:$0x75643120]  ;;  %v686_v27 = vld.sshfl [vmem:[#allocation1] sm:$0xff pattern:$0x75643120] }
 0x23d   : > { %692 = vrot.lane.b32.xlu0 %v688_v26, %s1317_s6  ;;  %690 = vrot.lane.b32.xlu2 %v686_v27, %s1317_s6  ;;  %704 = vst [vmem:[#allocation1] ss:$2 sm:$0xff] %v702_v25  ;;  %s1634_s6 = smov 126  }
 0x244   : > { %v707_v29 = vld.sshfl [vmem:[#allocation1 + $0x8] sm:$0xff pattern:$0x75643120]  ;;  %v705_v30 = vld.sshfl [vmem:[#allocation1] sm:$0xff pattern:$0x75643120] }
 0x245   : > { %711 = vrot.lane.b32.xlu2 %v707_v29, %s1318_s9  ;;  %709 = vrot.lane.b32.xlu1 %v705_v30, %s1318_s9  ;;  %724 = vst [vmem:[#allocation1 + $0x1] ss:$2 sm:$0xff] %v721_v28  ;;  %s1133_s9 = smul.u32 6, %s1300_s19 }
 0x24c   : > { %v727_v32 = vld.sshfl [vmem:[#allocation1 + $0x8] sm:$0xff pattern:$0x75643120]  ;;  %v725_v33 = vld.sshfl [vmem:[#allocation1] sm:$0xff pattern:$0x75643120] }
 0x24d   : > { %731 = vrot.lane.b32.xlu1 %v727_v32, %s1319_s10  ;;  %729 = vrot.lane.b32.xlu0 %v725_v33, %s1319_s10  ;;  %743 = vst [vmem:[#allocation1] ss:$2 sm:$0xff] %v741_v31 }
 0x254   : > { %v746_v35 = vld.sshfl [vmem:[#allocation1 + $0x8] sm:$0xff pattern:$0x75643120]  ;;  %v744_v36 = vld.sshfl [vmem:[#allocation1] sm:$0xff pattern:$0x75643120] }
 0x255   : > { %614 = vrot.lane.b32.xlu0 %v610_v15, %s1314_s27  ;;  %750 = vrot.lane.b32.xlu2 %v746_v35, %s1320_s11  ;;  %887 = vst [vmem:[#allocation1] ss:$2 sm:$0xff] %v863_v34 }
 0x256   : > { %748 = vrot.lane.b32.xlu1 %v744_v36, %s1320_s11 }
 0x25c   : > { %v891_v39 = vld.sshfl [vmem:[#allocation1 + $0x8] sm:$0xff pattern:$0x75316420]  ;;  %v890_v41 = vld.sshfl [vmem:[#allocation1] sm:$0xff pattern:$0x75316420] }
 0x25d   : > { %651 = vrot.lane.b32.xlu0 %v647_v20, %s1321_s12  ;;  %612 = vrot.lane.b32.xlu2 %v608_v14, %s1314_s27  ;;  %s242_s27 = sand.u32 1, %s1288_s16  }
 0x25e   : > { %631 = vrot.lane.b32.xlu1 %v627_v17, %s1634_s6  ;;  %s920_s13 = scalar_lea.sflag [#allocation5], %s242_s27 }
 0x265   : > { %633 = vrot.lane.b32.xlu2 %v629_v18, %s1634_s6  ;;  %879 = vperm.xlu0 %1217, %v1111_v19  }
 0x266   : > { %653 = vrot.lane.b32.xlu1 %v649_v21, %s1321_s12 }
 0x26d   : > { %869 = vperm.xlu2 %1216, %v1110_v38  }
 0x26e   : > { %895 = vrot.lane.b32.xlu1 %v891_v39, %s1316_s5 }
 0x275   : > { %897 = vrot.lane.b32.xlu2 %v892_v40, %s1316_s5 }
 0x276   : > { %893 = vrot.lane.b32.xlu1 %v890_v41, %s1316_s5  ;;  %s1132_s5 = smul.u32 3, %s1296_s18 }
 0x278   : > { %s931_s10 = sadd.s32 %s1133_s9, %s1132_s5  ;;  %s1238_s9 = scalar_lea.hbm %s1625_s4, 48 }
 0x279   : > { %s1112_s12 = sshll.u32 %s931_s10, 2 }
 0x27a   : > { %s933_s24 = scalar_lea.hbm %s1625_s4, %s1112_s12 }
 0x27b   : > { %s937_s8 = sshll.u32 %s933_s24, 4  ;;  %s938_s8 = int_to_ptr.hbm [resolvable:$true] %s937_s8 }
 0x27c   : > { %s1232_s14 = sshra.s32 %s938_s8, 4  ;;  %s1233_s14 = int_to_ptr.hbm [resolvable:$true] %s1232_s14 }
 0x27d   : > { %s1234_s6 = scalar_lea.hbm %s1233_s14, 12  ;;  %p1239_p4 = scmp.lt.s32.totalorder %s1233_s14, %s1625_s4 }
 0x27e   : > { %p1235_p0 = scmp.ne.s32.totalorder %s1233_s14, %s1234_s6  ;;  %p1240_p5 = scmp.lt.s32.totalorder %s1238_s9, %s1234_s6 }
 0x280   : > { %p1236_p1 = pnand %p1235_p0, %p1400_p3  ;;  %p1241_p6 = por %p1240_p5, %p1239_p4 }
 0x282   : > { %p1237_p2 = pneg %p1236_p1 }
 0x284   : > { %p1242_p7 = pnand %p1241_p6, %p1237_p2 }
 0x297   : > { %v691_v0 = vpop.permute.xlu2 %690 }
 0x298   : > { %v694_v51 = vrot.slane %v691_v0, 4 }
 0x29f   : > { %v712_v42 = vpop.permute.xlu2 %711 }
 0x2a0   : > { %720 = vst.msk [vmem:[#allocation2 + $0x2c] sm:$0x3] %vm273_vm0, %v712_v42  ;;  %v714_v57 = vrot.slane %v712_v42, 4 }
 0x2a7   : > { %v673_v43 = vpop.permute.xlu1 %672  ;;  %v671_v44 = vpop.permute.xlu0 %670 }
 0x2a8   : > { %v675_v45 = vrot.slane %v673_v43, 4  ;;  %681 = vst.msk [vmem:[#allocation2 + $0x20] sm:$0x3] %vm273_vm0, %v673_v43  ;;  %v674_v46 = vrot.slane %v671_v44, 4 }
 0x2aa   : > { %v676_v47 = vsel %vm287_vm2, %v674_v46, %v675_v45 }
 0x2ab   : > { %v677_v48 = vsel %vm345_vm3, %v671_v44, %v676_v47 }
 0x2ac   : > { %680 = vst [vmem:[#allocation2 + $0x18] sm:$0x33] %v677_v48 }
 0x2af   : > { %v693_v49 = vpop.permute.xlu0 %692  ;;  %v751_v50 = vpop.permute.xlu2 %750 }
 0x2b0   : > { %v695_v52 = vrot.slane %v693_v49, 4  ;;  %701 = vst.msk [vmem:[#allocation2 + $0x20] sm:$0xc] %vm294_vm1, %v693_v49  ;;  %v753_v16 = vrot.slane %v751_v50, 4  ;;  %v1082_v49 = vld [vmem:[%s1498_s30 + $0x2] sm:$0x3] }
 0x2b1   : > { %759 = vst.msk [vmem:[#allocation2 + $0x38] sm:$0x3] %vm273_vm0, %v751_v50  ;;  %s1129_s30 = smul.u32 12, %s242_s27 }
 0x2b2   : > { %v696_v53 = vsel %vm287_vm2, %v694_v51, %v695_v52 }
 0x2b3   : > { %v697_v54 = vsel %vm364_vm5, %v691_v0, %v696_v53  ;;  %vm1637_vm5 = vcmask 900096   ;;  %s244_s11 = scalar_lea.vmem [#allocation4], %s1129_s30 }
 0x2b4   : > { %700 = vst [vmem:[#allocation2 + $0x18] sm:$0xcc] %v697_v54  ;;  %s935_s23 = sshll.u32 %s244_s11, 4  ;;  %s936_s23 = int_to_ptr.vmem [resolvable:$true] %s935_s23 }
 0x2b7   : > { %v710_v55 = vpop.permute.xlu1 %709  ;;  %v613_v56 = vpop.permute.xlu2 %612  ;;  %v1105_v10 = vld [vmem:[#allocation2 + $0x20] sm:$0xf] }
 0x2b8   : > { %v713_v58 = vrot.slane %v710_v55, 4  ;;  %v771_v59 = vld [vmem:[#allocation2 + $0x38] sm:$0x3]  ;;  %v616_v12 = vrot.slane %v613_v56, 4 }
 0x2b9   : > { %v796_v60 = vunpack.c.l.b16 %v771_v59 }
 0x2ba   : > { %v715_v61 = vsel %vm287_vm2, %v713_v58, %v714_v57 }
 0x2bb   : > { %v716_v62 = vsel %vm382_vm4, %v710_v55, %v715_v61  ;;  %v805_v63 = vpack.c.b16 %v796_v60, %v796_v60  ;;  %vm1636_vm4 = vcmask 1031168   ;;  %v1097_v0 = vld [vmem:[#allocation2 + $0x18] sm:$0xf]  ;;  %v1126_v42 = vld [vmem:[#allocation2 + $0x1c] sm:$0xf] }
 0x2bc   : > { %719 = vst [vmem:[#allocation2 + $0x24] sm:$0x33] %v716_v62 }
 0x2bd   : > { %v822_v1 = vsel %vm480_vm10, %v805_v63, 0 }
 0x2be   : > { %855 = vmatpush.bf16.msrb.mxu1 %v822_v1 }
 0x2bf   : > { %v732_v2 = vpop.permute.xlu1 %731  ;;  %v730_v3 = vpop.permute.xlu0 %729 }
 0x2c0   : > { %v734_v4 = vrot.slane %v732_v2, 4  ;;  %740 = vst.msk [vmem:[#allocation2 + $0x2c] sm:$0xc] %vm294_vm1, %v732_v2  ;;  %v733_v5 = vrot.slane %v730_v3, 4  ;;  %v634_v6 = vpop.permute.xlu2 %633 }
 0x2c1   : > { %642 = vst.msk [vmem:[#allocation2 + $0x14] sm:$0x3] %vm273_vm0, %v634_v6  ;;  %vm1635_vm0 = vcmask 736256   ;;  %v636_v24 = vrot.slane %v634_v6, 4 }
 0x2c2   : > { %v735_v7 = vsel %vm287_vm2, %v733_v5, %v734_v4 }
 0x2c3   : > { %v736_v8 = vsel %vm401_vm8, %v730_v3, %v735_v7  ;;  %vm917_vm8 = vcmask 257024  }
 0x2c4   : > { %739 = vst [vmem:[#allocation2 + $0x24] sm:$0xcc] %v736_v8 }
 0x2c7   : > { %v615_v9 = vpop.permute.xlu0 %614  ;;  %v1128_v11 = vld [vmem:[#allocation2 + $0x28] sm:$0xf0] }
 0x2c8   : > { %v617_v13 = vrot.slane %v615_v9, 4  ;;  %623 = vst.msk [vmem:[#allocation2 + $0x8] sm:$0xc] %vm294_vm1, %v615_v9  ;;  %v749_v14 = vpop.permute.xlu1 %748  ;;  %v1106_v15 = vor.u32 %v1128_v11, %v1105_v10 }
 0x2c9   : > { %v752_v17 = vrot.slane %v749_v14, 4 }
 0x2ca   : > { %v618_v18 = vsel %vm287_vm2, %v616_v12, %v617_v13  ;;  %856 = vmatpush.bf16.msrb.mxu1 %v1106_v15 }
 0x2cb   : > { %v619_v20 = vsel %vm289_vm7, %v613_v56, %v618_v18  ;;  %v754_v21 = vsel %vm287_vm2, %v752_v17, %v753_v16  ;;  %v1127_v35 = vld [vmem:[#allocation2 + $0x20] sm:$0xf0]  ;;  %v1099_v36 = vld [vmem:[#allocation2 + $0x24] sm:$0xf0]  ;;  %v870_v56 = vpop.permute.xlu2 %869 }
 0x2cc   : > { %622 = vst [vmem:[#allocation2] sm:$0xcc] %v619_v20  ;;  %v755_v22 = vsel %vm1635_vm0, %v749_v14, %v754_v21  ;;  %v1098_v44 = vor.u32 %v1127_v35, %v1097_v0  ;;  %v1102_v45 = vor.u32 %v1126_v42, %v1099_v36 }
 0x2cd   : > { %758 = vst [vmem:[#allocation2 + $0x30] sm:$0x33] %v755_v22 }
 0x2cf   : > { %v652_v31 = vpop.permute.xlu0 %651  ;;  %v1093_v46 = vld [vmem:[#allocation2 + $0x8] sm:$0xf] }
 0x2d0   : > { %v632_v23 = vpop.permute.xlu1 %631  ;;  %v655_v37 = vrot.slane %v652_v31, 4 }
 0x2d1   : > { %v635_v25 = vrot.slane %v632_v23, 4 }
 0x2d3   : > { %v637_v26 = vsel %vm287_vm2, %v635_v25, %v636_v24  ;;  %v1085_v50 = vld [vmem:[#allocation2] sm:$0xf]  ;;  %v1123_v52 = vld [vmem:[#allocation2 + $0x4] sm:$0xf]  ;;  %v898_v62 = vpop.permute.xlu2 %897 }
 0x2d4   : > { %v638_v27 = vsel %vm1636_vm4, %v632_v23, %v637_v26  ;;  %v770_v28 = vld [vmem:[#allocation2 + $0x30] sm:$0x33] }
 0x2d5   : > { %641 = vst [vmem:[#allocation2 + $0xc] sm:$0x33] %v638_v27  ;;  %v794_v29 = vunpack.c.l.b16 %v770_v28  ;;  %v795_v30 = vunpack.c.h.b16 %v770_v28 }
 0x2d7   : > { %v803_v32 = vpack.c.b16 %v794_v29, %v794_v29  ;;  %v804_v33 = vpack.c.b16 %v795_v30, %v795_v30  ;;  %v880_v58 = vpop.permute.xlu0 %879 }
 0x2d8   : > { %v654_v34 = vpop.permute.xlu1 %653 }
 0x2d9   : > { %v656_v38 = vrot.slane %v654_v34, 4  ;;  %662 = vst.msk [vmem:[#allocation2 + $0x14] sm:$0xc] %vm294_vm1, %v654_v34  ;;  %v816_v39 = vsel %vm480_vm10, %v803_v32, 0  ;;  %v819_v40 = vsel %vm480_vm10, %v804_v33, 0  ;;  %vm1638_vm1 = vcmask 293888  }
 0x2da   : > { %829 = vmatpush.bf16.msra.mxu3 %v816_v39  ;;  %842 = vmatpush.bf16.msrb.mxu0 %v819_v40  ;;  %vm1639_vm6 = vmmov %vm1638_vm1 }
 0x2db   : > { %v657_v41 = vsel %vm287_vm2, %v655_v37, %v656_v38  ;;  %vm1640_vm7 = vmmov %vm1638_vm1 }
 0x2dc   : > { %v658_v43 = vsel %vm1637_vm5, %v652_v31, %v657_v41 }
 0x2dd   : > { %661 = vst [vmem:[#allocation2 + $0xc] sm:$0xcc] %v658_v43 }
 0x2de   : > { %830 = vmatpush.bf16.msra.mxu3 %v1098_v44  ;;  %843 = vmatpush.bf16.msrb.mxu0 %v1102_v45 }
 0x2e0   : > { %v1125_v47 = vld [vmem:[#allocation2 + $0x10] sm:$0xf0]  ;;  %v896_v59 = vpop.permute.xlu1 %895 }
 0x2e1   : > { %v1094_v48 = vor.u32 %v1125_v47, %v1093_v46  ;;  %v901_v5 = vsel %vm345_vm3, %v896_v59, %v898_v62 }
 0x2e3   : > { %857 = vmatpush.bf16.msrb.mxu1 %v1094_v48 }
 0x2e4   : > { %v1124_v51 = vld [vmem:[#allocation2 + $0x8] sm:$0xf0]  ;;  %v1087_v53 = vld [vmem:[#allocation2 + $0xc] sm:$0xf0] }
 0x2e5   : > { %v1086_v54 = vor.u32 %v1124_v51, %v1085_v50  ;;  %v1090_v55 = vor.u32 %v1123_v52, %v1087_v53 }
 0x2e6   : > { %1109 = vmatmul.msk.bf16.vlgmr.msrb.gmra.mxu1 %vm1638_vm1, %v1082_v49 }
 0x2e7   : > { %831 = vmatpush.bf16.msra.mxu3 %v1086_v54  ;;  %844 = vmatpush.bf16.msrb.mxu0 %v1090_v55 }
 0x2e8   : > { %v894_v9 = vpop.permute.xlu1 %893 }
 0x2e9   : > { %v900_v14 = vsel %vm345_vm3, %v894_v9, %v896_v59 }
 0x2ea   : > { %1107 = vmatmul.msk.bf16.vlgmr.msra.gmra.mxu3 %vm1639_vm6, %v1082_v49  ;;  %1108 = vmatmul.msk.bf16.vlgmr.msrb.gmra.mxu0 %vm1640_vm7, %v1082_v49 }
 0x363   : > { %v859_v57 = vpop.f32.mrf.mxu1 }
 0x364   : > { %v874_v60 = vmul.f32 %v870_v56, %v859_v57 }
 0x366   : > { %v884_v61 = vadd.f32 %v880_v58, %v874_v60 }
 0x367   : > { %v846_v63 = vpop.f32.mrf.mxu0 }
 0x368   : > { %v907_v1 = vadd.f32 %v898_v62, %v884_v61  ;;  %v873_v2 = vmul.f32 %v870_v56, %v846_v63 }
 0x36a   : > { %v910_v3 = vmax.f32 %v907_v1, 0.0  ;;  %v883_v4 = vadd.f32 %v880_v58, %v873_v2 }
 0x36b   : > { %v861_v6 = vpop.f32.mrf.mxu1 }
 0x36c   : > { %v906_v7 = vadd.f32 %v901_v5, %v883_v4  ;;  %918 = vst.msk [vmem:[%s244_s11 + $0x8] sm:$0xf] %vm917_vm8, %v910_v3 }
 0x36d   : > { %v833_v8 = vpop.f32.mrf.mxu3 }
 0x36e   : > { %v872_v10 = vmul.f32 %v870_v56, %v833_v8  ;;  %v909_v12 = vmax.f32 %v906_v7, 0.0 }
 0x36f   : > { %v848_v11 = vpop.f32.mrf.mxu0 }
 0x370   : > { %v882_v13 = vadd.f32 %v880_v58, %v872_v10  ;;  %v913_v16 = vrot.slane %v909_v12, 4 }
 0x372   : > { %v905_v15 = vadd.f32 %v900_v14, %v882_v13 }
 0x374   : > { %v908_v17 = vmax.f32 %v905_v15, 0.0 }
 0x375   : > { %v835_v18 = vpop.f32.mrf.mxu3 }
 0x376   : > { %v914_v19 = vsel %vm287_vm2, %v908_v17, %v913_v16 }
 0x377   : > { %916 = vst [vmem:[%s244_s11] sm:$0xff] %v914_v19 }
 0x378   : > { %1245 = shalt.err (!%p1242_p7)
}
 0x379   : > { %1134 = dma.vmem_to_hbm [thread:$0]  (%p1400_p3), %s936_s23, 192, %s938_s8, %s920_s13  }
 0x37a PF: > { %p1140_p9 = scmp.ge.s32.totalorder %s1312_s22, 2  ;;  %s949_s27 = sand.u32 1, %s1284_s15  }
 0x37b   : > { %s950_s11 = scalar_lea.sflag [#allocation5], %s949_s27 }
 0x37c   : > { %p1137_p10 = pnand %p1140_p9, %p1409_p8 }
 0x37e   : > { %p1138_p11 = pneg %p1137_p10 }
 0x380   : > { %1279 = dma.done.wait (%p1138_p11), %s950_s11, 192  }
 0x381   : > { %1281 = vsyncadd (%p1138_p11), %s950_s11, 4294967104  ;;  %s17_s22 = sadd.s32 1, %s1312_s22   ;;  %s1641_s15 = smov %s1288_s16 }
 0x382   : > { %p14_p12 = scmp.ge.s32.totalorder %s17_s22, 6   ;;  %s1642_s16 = smov %s1292_s17 }
 0x383   : > { %s1643_s17 = smov %s1418_s7  ;;  %s1644_s18 = smov %s1304_s20 }
 0x384   : > { %s1645_s19 = smov %s1308_s21  ;;  %s1646_s20 = smov %s1649_s25 }
 0x385   : > { %s1647_s21 = smov %s1653_s26  ;;  %16 = sbr.rel (!%p14_p12) target bundleno = 5 (0x5), region = 90 }
 0x38a   :  { %956 = vsyncpa [#allocation5], 1 }
 0x38b   :  { %958 = vsyncpa [#allocation5 + $0x1], 1 }

</bundles_post_ra>
